<compile_context>
chip_gen: v7x
topology: tpu7x:2x2x1
jax: 0.10.0
libtpu: 0.0.40
codegen_flags: <defaults>
</compile_context>

<pallas_src>
import functools
import math

import jax
import jax.numpy as jnp
from jax import lax
from jax.experimental import pallas as pl
from jax.experimental.pallas import tpu as pltpu

# Above the 32 MiB scoped default, comfortably under physical VMEM on v5e/v6e/v7x.
_VMEM_LIMIT = 48 * 1024 * 1024


def _pick_tile(n, preferred):
    """Largest tile <= preferred that divides n (multiple of 8 if possible), else n."""
    if n <= preferred:
        return n
    for cand in (preferred, 512, 256, 128, 64, 32, 16, 8):
        if cand <= preferred and n % cand == 0:
            return cand
    return n


# ---------------------------------------------------------------------------
# 1) Per-head QKV projection. grid = (B, seq_tiles, H)
# ---------------------------------------------------------------------------
def _qkv_proj_kernel(x_ref, wq_ref, wk_ref, wv_ref, bq_ref, bk_ref, bv_ref,
                     q_ref, k_ref, v_ref):
    x = x_ref[0]                                          # (tile, C) bf16

    def proj(w_ref, b_ref):
        acc = jnp.dot(x, w_ref[0], preferred_element_type=jnp.float32)
        return acc + b_ref[0]                             # (tile, HD) f32

    q_ref[0, 0] = proj(wq_ref, bq_ref).astype(q_ref.dtype)
    k_ref[0, 0] = proj(wk_ref, bk_ref).astype(k_ref.dtype)
    v_ref[0, 0] = proj(wv_ref, bv_ref).astype(v_ref.dtype)


# ---------------------------------------------------------------------------
# 2) Flash attention. grid = (B, H, q_tiles, kv_tiles), kv innermost (reduction)
# ---------------------------------------------------------------------------
def _flash_attn_kernel(q_ref, k_ref, v_ref, o_ref, m_sc, l_sc, acc_sc,
                       *, tq, tk):
    qi = pl.program_id(2)
    ki = pl.program_id(3)
    nk = pl.num_programs(3)

    @pl.when(ki == 0)
    def _init():
        m_sc[...] = jnp.full_like(m_sc, -jnp.inf)
        l_sc[...] = jnp.zeros_like(l_sc)
        acc_sc[...] = jnp.zeros_like(acc_sc)

    q_start = qi * tq
    k_start = ki * tk
    # kv tile entirely in the future of this q tile -> skip all compute.
    not_skipped = k_start <= q_start + (tq - 1)
    # tile touches the causal diagonal -> needs the iota mask.
    straddles = (k_start + tk - 1) > q_start

    def update(masked):
        q = q_ref[0, 0]                                   # (tq, HD) bf16 (pre-scaled)
        k = k_ref[0, 0]                                   # (tk, HD) bf16
        s = lax.dot_general(q, k, (((1,), (1,)), ((), ())),
                            preferred_element_type=jnp.float32)   # (tq, tk) f32
        if masked:
            row = q_start + lax.broadcasted_iota(jnp.int32, (tq, tk), 0)
            col = k_start + lax.broadcasted_iota(jnp.int32, (tq, tk), 1)
            s = jnp.where(col <= row, s, -1e30)
        m_prev = m_sc[...]
        m_new = jnp.maximum(m_prev, jnp.max(s, axis=-1, keepdims=True))
        alpha = jnp.exp(m_prev - m_new)
        p = jnp.exp(s - m_new)
        l_sc[...] = alpha * l_sc[...] + jnp.sum(p, axis=-1, keepdims=True)
        acc_sc[...] = alpha * acc_sc[...] + jnp.dot(
            p.astype(v_ref.dtype), v_ref[0, 0],
            preferred_element_type=jnp.float32)
        m_sc[...] = m_new

    @pl.when(jnp.logical_and(not_skipped, straddles))
    def _masked():
        update(True)

    @pl.when(jnp.logical_and(not_skipped, jnp.logical_not(straddles)))
    def _unmasked():
        update(False)

    @pl.when(ki == nk - 1)
    def _finalize():
        inv_l = pl.reciprocal(l_sc[...], approx=True)
        o_ref[0, 0] = (acc_sc[...] * inv_l).astype(o_ref.dtype)


# ---------------------------------------------------------------------------
# 3) Output projection, heads reduced into a lane-dense (tile, C) accumulator.
#    grid = (B, seq_tiles, H), H innermost (reduction)
# ---------------------------------------------------------------------------
def _out_proj_kernel(y_ref, w_ref, b_ref, o_ref, acc_ref):
    h = pl.program_id(2)
    nh = pl.num_programs(2)

    @pl.when(h == 0)
    def _init():
        acc_ref[...] = jnp.broadcast_to(b_ref[...], acc_ref.shape)

    acc_ref[...] += jnp.dot(y_ref[0, 0], w_ref[0],
                            preferred_element_type=jnp.float32)

    @pl.when(h == nh - 1)
    def _finalize():
        o_ref[0] = acc_ref[...].astype(o_ref.dtype)


# ---------------------------------------------------------------------------
# Wrapper
# ---------------------------------------------------------------------------
def causal_self_attention(x, w_attn, b_attn, w_proj, b_proj, *, n_head,
                          compute_dtype=jnp.bfloat16, seq_tile=256):
    """x: (B,T,C); w_attn: (C,3C); b_attn: (3C,); w_proj: (C,C); b_proj: (C,)."""
    B, T, C = x.shape
    assert C % n_head == 0
    H = n_head
    HD = C // H
    tile = _pick_tile(T, seq_tile)   # 256-aligned on v6e/v7x; pass 128 for v5e
    nt = T // tile
    scale = 1.0 / math.sqrt(HD)

    f32 = jnp.float32
    w_attn = w_attn.astype(f32)
    b_attn = b_attn.astype(f32)
    wq, wk, wv = w_attn[:, :C], w_attn[:, C:2 * C], w_attn[:, 2 * C:]
    bq, bk, bv = b_attn[:C], b_attn[C:2 * C], b_attn[2 * C:]

    def head_w(w):                                   # (C, C) -> (H, C, HD)
        return w.reshape(C, H, HD).transpose(1, 0, 2)

    def head_b(b):                                   # (C,) -> (H, 1, HD)
        return b.reshape(H, 1, HD)

    # Fold the 1/sqrt(HD) attention scale into the Q projection.
    wq_h = (head_w(wq) * scale).astype(compute_dtype)
    wk_h = head_w(wk).astype(compute_dtype)
    wv_h = head_w(wv).astype(compute_dtype)
    bq_h = head_b(bq) * scale                        # f32 (added to f32 accumulator)
    bk_h = head_b(bk)
    bv_h = head_b(bv)

    wp_h = w_proj.astype(f32).reshape(H, HD, C).astype(compute_dtype)
    bp = b_proj.astype(f32).reshape(1, C)

    xc = x.astype(compute_dtype)

    # ---- 1) QKV projection --------------------------------------------------
    whead_spec = pl.BlockSpec((1, C, HD), lambda b, t, h: (h, 0, 0))
    bhead_spec = pl.BlockSpec((1, 1, HD), lambda b, t, h: (h, 0, 0))
    qkv_out_spec = pl.BlockSpec((1, 1, tile, HD), lambda b, t, h: (b, h, t, 0))
    q, k, v = pl.pallas_call(
        _qkv_proj_kernel,
        out_shape=(jax.ShapeDtypeStruct((B, H, T, HD), compute_dtype),) * 3,
        grid_spec=pltpu.PrefetchScalarGridSpec(
            num_scalar_prefetch=0,
            grid=(B, nt, H),
            in_specs=[
                pl.BlockSpec((1, tile, C), lambda b, t, h: (b, t, 0)),
                whead_spec, whead_spec, whead_spec,
                bhead_spec, bhead_spec, bhead_spec,
            ],
            out_specs=(qkv_out_spec,) * 3,
        ),
        compiler_params=pltpu.CompilerParams(
            dimension_semantics=("parallel", "parallel", "parallel"),
            vmem_limit_bytes=_VMEM_LIMIT),
    )(xc, wq_h, wk_h, wv_h, bq_h, bk_h, bv_h)

    # ---- 2) Flash attention -------------------------------------------------
    q_spec = pl.BlockSpec((1, 1, tile, HD), lambda b, h, qi, ki: (b, h, qi, 0))
    kv_spec = pl.BlockSpec((1, 1, tile, HD), lambda b, h, qi, ki: (b, h, ki, 0))
    y_heads = pl.pallas_call(
        functools.partial(_flash_attn_kernel, tq=tile, tk=tile),
        out_shape=jax.ShapeDtypeStruct((B, H, T, HD), compute_dtype),
        grid_spec=pltpu.PrefetchScalarGridSpec(
            num_scalar_prefetch=0,
            grid=(B, H, nt, nt),
            in_specs=[q_spec, kv_spec, kv_spec],
            out_specs=pl.BlockSpec((1, 1, tile, HD),
                                   lambda b, h, qi, ki: (b, h, qi, 0)),
            scratch_shapes=[
                pltpu.VMEM((tile, 1), jnp.float32),    # running max
                pltpu.VMEM((tile, 1), jnp.float32),    # running sum
                pltpu.VMEM((tile, HD), jnp.float32),   # output accumulator
            ],
        ),
        compiler_params=pltpu.CompilerParams(
            dimension_semantics=("parallel", "parallel", "parallel", "arbitrary"),
            vmem_limit_bytes=_VMEM_LIMIT),
    )(q, k, v)

    # ---- 3) Output projection (reduce over heads, lane-dense (T, C) out) ----
    out = pl.pallas_call(
        _out_proj_kernel,
        out_shape=jax.ShapeDtypeStruct((B, T, C), x.dtype),
        grid_spec=pltpu.PrefetchScalarGridSpec(
            num_scalar_prefetch=0,
            grid=(B, nt, H),
            in_specs=[
                pl.BlockSpec((1, 1, tile, HD), lambda b, t, h: (b, h, t, 0)),
                pl.BlockSpec((1, HD, C), lambda b, t, h: (h, 0, 0)),
                pl.BlockSpec((1, C), lambda b, t, h: (0, 0)),
            ],
            out_specs=pl.BlockSpec((1, tile, C), lambda b, t, h: (b, t, 0)),
            scratch_shapes=[pltpu.VMEM((tile, C), jnp.float32)],
        ),
        compiler_params=pltpu.CompilerParams(
            dimension_semantics=("parallel", "parallel", "arbitrary"),
            vmem_limit_bytes=_VMEM_LIMIT),
    )(y_heads, wp_h, bp)
    return out


def _reference(x, w_attn, b_attn, w_proj, b_proj, n_head):
    """Pure-JAX reference matching the PyTorch forward."""
    B, T, C = x.shape
    hd = C // n_head
    qkv = x @ w_attn + b_attn
    q, k, v = jnp.split(qkv, 3, axis=2)

    def to_heads(t):
        return t.reshape(B, T, n_head, hd).transpose(0, 2, 1, 3)

    q, k, v = to_heads(q), to_heads(k), to_heads(v)
    scores = jnp.einsum('bhtd,bhsd->bhts', q, k) / math.sqrt(hd)
    mask = jnp.tril(jnp.ones((T, T), dtype=bool))
    scores = jnp.where(mask[None, None], scores, -jnp.inf)
    p = jax.nn.softmax(scores, axis=-1)
    y = jnp.einsum('bhts,bhsd->bhtd', p, v)
    y = y.transpose(0, 2, 1, 3).reshape(B, T, C)
    return y @ w_proj + b_proj


if __name__ == "__main__":
    # Small GPT-2-ish config: B=2, T=8, n_embd=32, n_head=4 (head_dim=8).
    B, T, C, n_head = 2, 8, 32, 4

    key = jax.random.PRNGKey(0)
    kx, k1, k2, k3, k4 = jax.random.split(key, 5)

    x = jax.random.normal(kx, (B, T, C), dtype=jnp.float32)

    bound = 1.0 / math.sqrt(C)
    w_attn = jax.random.uniform(k1, (C, 3 * C), jnp.float32, -bound, bound)
    b_attn = jax.random.uniform(k2, (3 * C,), jnp.float32, -bound, bound)
    w_proj = jax.random.uniform(k3, (C, C), jnp.float32, -bound, bound)
    b_proj = jax.random.uniform(k4, (C,), jnp.float32, -bound, bound)

    out = causal_self_attention(x, w_attn, b_attn, w_proj, b_proj,
                                n_head=n_head)
    out = jax.block_until_ready(out)

    ref = _reference(x, w_attn, b_attn, w_proj, b_proj, n_head)
    assert out.shape == (B, T, C)
    err = float(jnp.max(jnp.abs(out - ref)))
    # bf16 matmul operands + approx reciprocal -> loose tolerance vs f32 reference.
    assert err < 5e-2, f"max abs err {err}"

    print("KERNEL_OK")
</pallas_src>

<mosaic_0001>
module attributes {stable_mosaic.version = 11 : i64} {
  func.func @_qkv_proj_kernel(%arg0: i32, %arg1: i32, %arg2: i32, %arg3: memref<1x8x32xbf16, #tpu.memory_space<vmem>>, %arg4: memref<1x32x8xbf16, #tpu.memory_space<vmem>>, %arg5: memref<1x32x8xbf16, #tpu.memory_space<vmem>>, %arg6: memref<1x32x8xbf16, #tpu.memory_space<vmem>>, %arg7: memref<1x1x8xf32, #tpu.memory_space<vmem>>, %arg8: memref<1x1x8xf32, #tpu.memory_space<vmem>>, %arg9: memref<1x1x8xf32, #tpu.memory_space<vmem>>, %arg10: memref<1x1x8x8xbf16, #tpu.memory_space<vmem>>, %arg11: memref<1x1x8x8xbf16, #tpu.memory_space<vmem>>, %arg12: memref<1x1x8x8xbf16, #tpu.memory_space<vmem>>) attributes {dimension_semantics = [#tpu.dimension_semantics<parallel>, #tpu.dimension_semantics<parallel>, #tpu.dimension_semantics<parallel>], iteration_bounds = array<i64: 2, 1, 4>, scalar_prefetch = 0 : i64, scratch_operands = 0 : i64, tpu.core_type = #tpu.core_type<tc>, window_params = [{transform_indices = @transform_0, window_bounds = array<i64: 1, 8, 32>}, {transform_indices = @transform_1, window_bounds = array<i64: 1, 32, 8>}, {transform_indices = @transform_2, window_bounds = array<i64: 1, 32, 8>}, {transform_indices = @transform_3, window_bounds = array<i64: 1, 32, 8>}, {transform_indices = @transform_4, window_bounds = array<i64: 1, 1, 8>}, {transform_indices = @transform_5, window_bounds = array<i64: 1, 1, 8>}, {transform_indices = @transform_6, window_bounds = array<i64: 1, 1, 8>}, {transform_indices = @transform_7, window_bounds = array<i64: 1, 1, 8, 8>}, {transform_indices = @transform_8, window_bounds = array<i64: 1, 1, 8, 8>}, {transform_indices = @transform_9, window_bounds = array<i64: 1, 1, 8, 8>}]} {
    %c0 = arith.constant 0 : index
    %c0_0 = arith.constant 0 : index
    %c0_1 = arith.constant 0 : index
    %0 = vector.load %arg3[%c0, %c0_0, %c0_1] : memref<1x8x32xbf16, #tpu.memory_space<vmem>>, vector<1x8x32xbf16>
    %1 = vector.shape_cast %0 : vector<1x8x32xbf16> to vector<8x32xbf16>
    %c0_2 = arith.constant 0 : index
    %c0_3 = arith.constant 0 : index
    %c0_4 = arith.constant 0 : index
    %2 = vector.load %arg4[%c0_2, %c0_3, %c0_4] : memref<1x32x8xbf16, #tpu.memory_space<vmem>>, vector<1x32x8xbf16>
    %3 = vector.shape_cast %2 : vector<1x32x8xbf16> to vector<32x8xbf16>
    %cst = arith.constant dense<0.000000e+00> : vector<8x8xf32>
    %4 = tpu.matmul %1, %3, %cst {dimension_numbers = #tpu.dot_dimension_numbers<[1], [0], [0], [1], [0, 0, 1, 1], [], []>} : vector<8x32xbf16>, vector<32x8xbf16>, vector<8x8xf32> -> vector<8x8xf32>
    %c0_5 = arith.constant 0 : index
    %c0_6 = arith.constant 0 : index
    %c0_7 = arith.constant 0 : index
    %5 = vector.load %arg7[%c0_5, %c0_6, %c0_7] : memref<1x1x8xf32, #tpu.memory_space<vmem>>, vector<1x1x8xf32>
    %6 = vector.shape_cast %5 : vector<1x1x8xf32> to vector<1x8xf32>
    %7 = vector.broadcast %6 : vector<1x8xf32> to vector<8x8xf32>
    %8 = arith.addf %4, %7 : vector<8x8xf32>
    %9 = arith.truncf %8 : vector<8x8xf32> to vector<8x8xbf16>
    %c0_8 = arith.constant 0 : index
    %c0_9 = arith.constant 0 : index
    %c0_10 = arith.constant 0 : index
    %c0_11 = arith.constant 0 : index
    %10 = vector.load %arg10[%c0_8, %c0_9, %c0_10, %c0_11] : memref<1x1x8x8xbf16, #tpu.memory_space<vmem>>, vector<1x1x8x8xbf16>
    %11 = vector.shape_cast %10 : vector<1x1x8x8xbf16> to vector<8x8xbf16>
    %12 = vector.shape_cast %9 : vector<8x8xbf16> to vector<1x1x8x8xbf16>
    tpu.vector_store %arg10[%c0_8, %c0_9, %c0_10, %c0_11], %12 {strides = array<i32>} : memref<1x1x8x8xbf16, #tpu.memory_space<vmem>>, vector<1x1x8x8xbf16>,
    %c0_12 = arith.constant 0 : index
    %c0_13 = arith.constant 0 : index
    %c0_14 = arith.constant 0 : index
    %13 = vector.load %arg5[%c0_12, %c0_13, %c0_14] : memref<1x32x8xbf16, #tpu.memory_space<vmem>>, vector<1x32x8xbf16>
    %14 = vector.shape_cast %13 : vector<1x32x8xbf16> to vector<32x8xbf16>
    %cst_15 = arith.constant dense<0.000000e+00> : vector<8x8xf32>
    %15 = tpu.matmul %1, %14, %cst_15 {dimension_numbers = #tpu.dot_dimension_numbers<[1], [0], [0], [1], [0, 0, 1, 1], [], []>} : vector<8x32xbf16>, vector<32x8xbf16>, vector<8x8xf32> -> vector<8x8xf32>
    %c0_16 = arith.constant 0 : index
    %c0_17 = arith.constant 0 : index
    %c0_18 = arith.constant 0 : index
    %16 = vector.load %arg8[%c0_16, %c0_17, %c0_18] : memref<1x1x8xf32, #tpu.memory_space<vmem>>, vector<1x1x8xf32>
    %17 = vector.shape_cast %16 : vector<1x1x8xf32> to vector<1x8xf32>
    %18 = vector.broadcast %17 : vector<1x8xf32> to vector<8x8xf32>
    %19 = arith.addf %15, %18 : vector<8x8xf32>
    %20 = arith.truncf %19 : vector<8x8xf32> to vector<8x8xbf16>
    %c0_19 = arith.constant 0 : index
    %c0_20 = arith.constant 0 : index
    %c0_21 = arith.constant 0 : index
    %c0_22 = arith.constant 0 : index
    %21 = vector.load %arg11[%c0_19, %c0_20, %c0_21, %c0_22] : memref<1x1x8x8xbf16, #tpu.memory_space<vmem>>, vector<1x1x8x8xbf16>
    %22 = vector.shape_cast %21 : vector<1x1x8x8xbf16> to vector<8x8xbf16>
    %23 = vector.shape_cast %20 : vector<8x8xbf16> to vector<1x1x8x8xbf16>
    tpu.vector_store %arg11[%c0_19, %c0_20, %c0_21, %c0_22], %23 {strides = array<i32>} : memref<1x1x8x8xbf16, #tpu.memory_space<vmem>>, vector<1x1x8x8xbf16>,
    %c0_23 = arith.constant 0 : index
    %c0_24 = arith.constant 0 : index
    %c0_25 = arith.constant 0 : index
    %24 = vector.load %arg6[%c0_23, %c0_24, %c0_25] : memref<1x32x8xbf16, #tpu.memory_space<vmem>>, vector<1x32x8xbf16>
    %25 = vector.shape_cast %24 : vector<1x32x8xbf16> to vector<32x8xbf16>
    %cst_26 = arith.constant dense<0.000000e+00> : vector<8x8xf32>
    %26 = tpu.matmul %1, %25, %cst_26 {dimension_numbers = #tpu.dot_dimension_numbers<[1], [0], [0], [1], [0, 0, 1, 1], [], []>} : vector<8x32xbf16>, vector<32x8xbf16>, vector<8x8xf32> -> vector<8x8xf32>
    %c0_27 = arith.constant 0 : index
    %c0_28 = arith.constant 0 : index
    %c0_29 = arith.constant 0 : index
    %27 = vector.load %arg9[%c0_27, %c0_28, %c0_29] : memref<1x1x8xf32, #tpu.memory_space<vmem>>, vector<1x1x8xf32>
    %28 = vector.shape_cast %27 : vector<1x1x8xf32> to vector<1x8xf32>
    %29 = vector.broadcast %28 : vector<1x8xf32> to vector<8x8xf32>
    %30 = arith.addf %26, %29 : vector<8x8xf32>
    %31 = arith.truncf %30 : vector<8x8xf32> to vector<8x8xbf16>
    %c0_30 = arith.constant 0 : index
    %c0_31 = arith.constant 0 : index
    %c0_32 = arith.constant 0 : index
    %c0_33 = arith.constant 0 : index
    %32 = vector.load %arg12[%c0_30, %c0_31, %c0_32, %c0_33] : memref<1x1x8x8xbf16, #tpu.memory_space<vmem>>, vector<1x1x8x8xbf16>
    %33 = vector.shape_cast %32 : vector<1x1x8x8xbf16> to vector<8x8xbf16>
    %34 = vector.shape_cast %31 : vector<8x8xbf16> to vector<1x1x8x8xbf16>
    tpu.vector_store %arg12[%c0_30, %c0_31, %c0_32, %c0_33], %34 {strides = array<i32>} : memref<1x1x8x8xbf16, #tpu.memory_space<vmem>>, vector<1x1x8x8xbf16>,
    return
  }
  func.func @transform_0(%arg0: i32, %arg1: i32, %arg2: i32) -> (i32, i32, i32) {
    %c0_i32 = arith.constant 0 : i32
    %c0_i32_0 = arith.constant 0 : i32
    return %arg0, %arg1, %c0_i32 : i32, i32, i32
  }
  func.func @transform_1(%arg0: i32, %arg1: i32, %arg2: i32) -> (i32, i32, i32) {
    %c0_i32 = arith.constant 0 : i32
    %c0_i32_0 = arith.constant 0 : i32
    %c0_i32_1 = arith.constant 0 : i32
    return %arg2, %c0_i32, %c0_i32_0 : i32, i32, i32
  }
  func.func @transform_2(%arg0: i32, %arg1: i32, %arg2: i32) -> (i32, i32, i32) {
    %c0_i32 = arith.constant 0 : i32
    %c0_i32_0 = arith.constant 0 : i32
    %c0_i32_1 = arith.constant 0 : i32
    return %arg2, %c0_i32, %c0_i32_0 : i32, i32, i32
  }
  func.func @transform_3(%arg0: i32, %arg1: i32, %arg2: i32) -> (i32, i32, i32) {
    %c0_i32 = arith.constant 0 : i32
    %c0_i32_0 = arith.constant 0 : i32
    %c0_i32_1 = arith.constant 0 : i32
    return %arg2, %c0_i32, %c0_i32_0 : i32, i32, i32
  }
  func.func @transform_4(%arg0: i32, %arg1: i32, %arg2: i32) -> (i32, i32, i32) {
    %c0_i32 = arith.constant 0 : i32
    %c0_i32_0 = arith.constant 0 : i32
    %c0_i32_1 = arith.constant 0 : i32
    return %arg2, %c0_i32, %c0_i32_0 : i32, i32, i32
  }
  func.func @transform_5(%arg0: i32, %arg1: i32, %arg2: i32) -> (i32, i32, i32) {
    %c0_i32 = arith.constant 0 : i32
    %c0_i32_0 = arith.constant 0 : i32
    %c0_i32_1 = arith.constant 0 : i32
    return %arg2, %c0_i32, %c0_i32_0 : i32, i32, i32
  }
  func.func @transform_6(%arg0: i32, %arg1: i32, %arg2: i32) -> (i32, i32, i32) {
    %c0_i32 = arith.constant 0 : i32
    %c0_i32_0 = arith.constant 0 : i32
    %c0_i32_1 = arith.constant 0 : i32
    return %arg2, %c0_i32, %c0_i32_0 : i32, i32, i32
  }
  func.func @transform_7(%arg0: i32, %arg1: i32, %arg2: i32) -> (i32, i32, i32, i32) {
    %c0_i32 = arith.constant 0 : i32
    %c0_i32_0 = arith.constant 0 : i32
    return %arg0, %arg2, %arg1, %c0_i32 : i32, i32, i32, i32
  }
  func.func @transform_8(%arg0: i32, %arg1: i32, %arg2: i32) -> (i32, i32, i32, i32) {
    %c0_i32 = arith.constant 0 : i32
    %c0_i32_0 = arith.constant 0 : i32
    return %arg0, %arg2, %arg1, %c0_i32 : i32, i32, i32, i32
  }
  func.func @transform_9(%arg0: i32, %arg1: i32, %arg2: i32) -> (i32, i32, i32, i32) {
    %c0_i32 = arith.constant 0 : i32
    %c0_i32_0 = arith.constant 0 : i32
    return %arg0, %arg2, %arg1, %c0_i32 : i32, i32, i32, i32
  }
}

</mosaic_0001>

<bundles_post_ra>
// kernel: tpu_custom_call.1
= control target key start
LH: loop header
LB: loop body
LE: loop exit
PB: predicated region body
PF: predicated region fallthrough
CT: control target
= control target key end

     0   :  { %15 = vsyncpa [#allocation3], 0  ;;  %s1591_s0 = inlined_call_operand.vmem [shape: bf16[2,8,32], index: 0, kind: input, shape index: {}]   ;;  %s1592_s1 = inlined_call_operand.vmem [shape: bf16[4,32,8], index: 1, kind: input, shape index: {}]   ;;  %s1593_s2 = inlined_call_operand.vmem [shape: bf16[4,32,8], index: 2, kind: input, shape index: {}]   ;;  %s1594_s3 = inlined_call_operand.vmem [shape: bf16[4,32,8], index: 3, kind: input, shape index: {}]   ;;  %s1595_s4 = inlined_call_operand.vmem [shape: f32[4,1,8], index: 4, kind: input, shape index: {}]   ;;  %s1596_s5 = inlined_call_operand.vmem [shape: f32[4,1,8], index: 5, kind: input, shape index: {}]   ;;  %s1597_s6 = inlined_call_operand.vmem [shape: f32[4,1,8], index: 6, kind: input, shape index: {}]   ;;  %s1598_s7 = inlined_call_operand.hbm [shape: bf16[2,4,8,8], index: 7, kind: output, shape index: {0}]   ;;  %s1599_s8 = inlined_call_operand.hbm [shape: bf16[2,4,8,8], index: 8, kind: output, shape index: {1}]   ;;  %s1600_s9 = inlined_call_operand.hbm [shape: bf16[2,4,8,8], index: 9, kind: output, shape index: {2}]  }
   0x1   :  { %17 = vsyncpa [#allocation3 + $0x1], 0 }
   0x2   :  { %18 = vsyncpa [#allocation5], 0 }
   0x3   :  { %20 = vsyncpa [#allocation5 + $0x1], 0  ;;  %s1334_s30 = smov 0   ;;  %s1336_s10 = smov 0  }
   0x4   :  { %s1338_s11 = smov 0   ;;  %s1340_s12 = smov 0  }
   0x5   :  { %s1342_s13 = smov 0   ;;  %s1344_s14 = smov 0  }
   0x6   :  { %s1346_s15 = smov 0   ;;  %s1348_s16 = smov 0  }
   0x7 LB: > { %1610 = sst [smem:[#allocation9_spill]] %s1249_s30  ;;  %s1602_s17 = sadd.s32 4294967295, %s1277_s16   ;;  %s1277_s16 = sphi %s1348_s16, %s26_s16   ;;  %s1273_s15 = sphi %s1346_s15, %s1629_s15   ;;  %s1269_s14 = sphi %s1344_s14, %s1628_s14   ;;  %s1265_s13 = sphi %s1342_s13, %s1627_s13   ;;  %s1261_s12 = sphi %s1340_s12, %s1626_s12   ;;  %s1257_s11 = sphi %s1338_s11, %s1625_s11   ;;  %s1253_s10 = sphi %s1336_s10, %s1631_s10   ;;  %s1249_s30 = sphi %s1334_s30, %s1630_s30  }
   0x8   : > { %1611 = sst [smem:[#allocation10_spill]] %s1257_s11  ;;  %s1601_s18 = sadd.s32 4294967294, %s1277_s16  }
   0x9   : > { %1612 = sst [smem:[#allocation11_spill]] %s1269_s14  ;;  %s38_s19 = sadd.s32 1, %s1269_s14 }
   0xa   : > { %1613 = sst [smem:[#allocation12_spill]] %s1273_s15  ;;  %p39_p0 = scmp.ge.s32.totalorder %s38_s19, 4 }
   0xb   : > { %s45_s20 = sadd.s32 1, %s1273_s15  ;;  %p250_p1 = scmp.ne.s32.totalorder %s1257_s11, %s1253_s10 }
   0xc   : > { %p251_p2 = scmp.eq.s32.totalorder %s1602_s17, 7  ;;  %s1633_s19 = smov (%p39_p0, %s38_s19), 0 }
   0xd   : > { %1614 = sst [smem:[#allocation13_spill]] %s1633_s19  ;;  %s1635_s20 = smov (!%p39_p0, %s45_s20), %s1273_s15 }
   0xe   : > { %s234_s21 = ssub.s32 %s1269_s14, %s1633_s19  ;;  %p1387_p3 = por %p251_p2, %p250_p1 }
   0xf   : > { %p47_p4 = scmp.ge.s32.totalorder %s1635_s20, 2  ;;  %p256_p5 = scmp.ne.s32.totalorder %s1253_s10, %s1249_s30 }
  0x10   : > { %p257_p6 = scmp.eq.s32.totalorder %s1601_s18, 7  ;;  %p964_p7 = scmp.ge.s32.totalorder %s1277_s16, 1 }
  0x11   : > { %s1637_s20 = smov (%p47_p4, %s1635_s20), 0  ;;  %p387_p9 = scmp.lt.s32.totalorder %s1277_s16, 9 }
  0x12   : > { %1616 = sst [smem:[#allocation14_spill]] %s1637_s20  ;;  %p1398_p8 = por %p257_p6, %p256_p5 }
  0x13   : > { %s233_s24 = ssub.s32 %s1273_s15, %s1637_s20  ;;  %s240_s25 = sadd.s32 1, %s1257_s11 }
  0x14   : > { %s1617_s23 = scalar_select %p1398_p8, 1, 0 }
  0x15   : > { %s235_s26 = sor.u32 %s234_s21, %s233_s24  ;;  %p388_p10 = pnand %p964_p7, %p387_p9 }
  0x16   : > { %1618 = sst [smem:[#allocation15_spill]] %s1617_s23  ;;  %p238_p11 = scmp.eq.s32.totalorder %s235_s26, 0  ;;  %v1279_v0 = vmov (!%p388_p10), 0.0   ;;  %vm1280_vm0 = vmmov (!%p388_p10), 0   ;;  %vm515_vm1 = vcmask (!%p388_p10), 261120   ;;  %vm560_vm2 = vcmask (!%p388_p10), 60416  }
  0x17   : > { %391 = sbr.rel (%p388_p10) target bundleno = 319 (0x13f), region = 48  ;;  %p466_p12 = scmp.lt.s32.totalorder (!%p388_p10), %s1261_s12, 3  ;;  %1010 = vmatprep.subr.bf16.mxu0 (!%p388_p10), %v1279_v0  ;;  %1018 = vmatprep.subr.bf16.mxu1 (!%p388_p10), %v1279_v0 }
  0x18   : > { %s1407_s27 = scalar_select %p238_p11, %s1257_s11, %s240_s25  }
  0x19   : > { %p459_p13 = scmp.lt.s32.totalorder (!%p388_p10), %s1265_s13, 1  ;;  %1014 = vmatprep.mubr.msk.bf16.mxu0 (!%p388_p10), %vm1280_vm0, %v1279_v0  ;;  %1022 = vmatprep.mubr.msk.bf16.mxu1 (!%p388_p10), %vm1280_vm0, %v1279_v0  ;;  %s442_s11 = sand.u32 (!%p388_p10), 1, %s1253_s10  }
  0x1a   : > { %1619 = sst [smem:[#allocation16_spill]] %s1407_s27  ;;  %s1439_s18 = sshll.u32 (!%p388_p10), %s442_s11, 2 }
  0x1b   : > { %s1620_s14 = sadd.s32 (!%p388_p10), 4294967295, %s1277_s16   ;;  %s693_s24 = scalar_lea.sflag (!%p388_p10), [#allocation3], %s442_s11 }
  0x1c   : > { %s1455_s15 = sand.u32 (!%p388_p10), 1, %s1620_s14   ;;  %s1281_s14 = smov (!%p388_p10), [#allocation2]  }
  0x1e   : > { %s1412_s28 = scalar_select %p466_p12, %s1261_s12, 3 }
  0x1f   : > { %s460_s29 = scalar_select %p459_p13, %s1265_s13, 1 }
  0x20   : > { %s998_s21 = sshll.u32 %s1412_s28, 4  ;;  %s483_s17 = scalar_lea.vmem %s1595_s4, %s1412_s28 }
  0x21   : > { %s470_s26 = scalar_lea.vmem %s1592_s1, %s998_s21  ;;  %s475_s20 = scalar_lea.vmem %s1593_s2, %s998_s21  ;;  %v975_v8 = vld [vmem:[%s483_s17] ss:$0 sm:$0xff] }
  0x22   : > { %v1117_v1 = vld [vmem:[%s470_s26] sm:$0xff]   ;;  %s968_s19 = sshll.u32 %s460_s29, 2  ;;  %v1118_v2 = vld [vmem:[%s470_s26 + $0x8] sm:$0xff]   ;;  %s480_s27 = scalar_lea.vmem %s1594_s3, %s998_s21 }
  0x23   : > { %1011 = vmatpush3.bf16.msra.mxu0 %v1117_v1  ;;  %v1119_v3 = vld [vmem:[%s475_s20] sm:$0xff]   ;;  %s465_s30 = scalar_lea.vmem %s1591_s0, %s968_s19  ;;  %v1121_v4 = vld [vmem:[%s475_s20 + $0x8] sm:$0xff]   ;;  %s486_s23 = scalar_lea.vmem %s1596_s5, %s1412_s28 }
  0x24   : > { %1012 = vmatprep.subr.bf16.mxu0 %v1279_v0  ;;  %1019 = vmatpush3.bf16.msra.mxu1 %v1119_v3  ;;  %v491_v5 = vld [vmem:[%s465_s30] sm:$0xf]  ;;  %v1122_v7 = vld [vmem:[%s480_s27 + $0x8] sm:$0xff]   ;;  %s990_s30 = sshll.u32 %s1265_s13, 2  ;;  %s444_s13 = scalar_lea.vmem [#allocation2], %s1439_s18 }
  0x25   : > { %1020 = vmatprep.subr.bf16.mxu1 %v1279_v0  ;;  %v1120_v6 = vld [vmem:[%s480_s27] sm:$0xff]   ;;  %s715_s27 = sadd.s32 %s1261_s12, %s990_s30  ;;  %s719_s21 = sshll.u32 %s444_s13, 4  ;;  %s1466_s21 = int_to_ptr.vmem [resolvable:$true] %s719_s21 }
  0x26   : > { %v979_v10 = vld [vmem:[%s486_s23] ss:$0 sm:$0xff]  ;;  %s1446_s29 = sshll.u32 %s715_s27, 6  ;;  %s489_s26 = scalar_lea.vmem %s1597_s6, %s1412_s28 }
  0x27   : > { %1013 = vmatpush3.bf16.msra.mxu0 %v1118_v2  ;;  %s451_s12 = scalar_lea.vmem [#allocation4], %s1439_s18  ;;  %s1464_s28 = scalar_lea.hbm %s1598_s7, %s1446_s29  ;;  %v983_v22 = vld [vmem:[%s489_s26] ss:$0 sm:$0xff] }
  0x28   : > { %1026 = vmatprep.subr.bf16.mxu0 %v1279_v0  ;;  %1021 = vmatpush3.bf16.msra.mxu1 %v1121_v4  ;;  %s735_s30 = sshll.u32 %s451_s12, 4  ;;  %s1472_s27 = scalar_lea.hbm %s1599_s8, %s1446_s29  ;;  %s1474_s30 = int_to_ptr.vmem [resolvable:$true] %s735_s30 }
  0x29   : > { %s1123_s25 = scalar_lea.vmem %s1466_s21, 64  ;;  %s1127_s17 = sshll.u32 %s1281_s14, 4  ;;  %s1128_s17 = int_to_ptr.vmem [resolvable:$false] %s1127_s17 }
  0x2a   : > { %1015 = vmatmul.mubr.msk.bf16.vlgmr.msra.gmra.mrb[0].mxu0 %vm515_vm1, %v491_v5  ;;  %p1124_p0 = scmp.ne.s32.totalorder %s1466_s21, %s1123_s25  ;;  %s1129_s19 = scalar_lea.vmem %s1128_s17, 128 }
  0x2b   : > { %1027 = vmatpush3.bf16.msra.mxu0 %v1120_v6  ;;  %1030 = vmatprep.mubr.msk.bf16.mxu0 %vm1280_vm0, %v1279_v0  ;;  %p1130_p4 = scmp.lt.s32.totalorder %s1466_s21, %s1128_s17  ;;  %p1131_p5 = scmp.lt.s32.totalorder %s1129_s19, %s1123_s25 }
  0x2c   : > { %1028 = vmatprep.subr.bf16.mxu0 %v1279_v0  ;;  %1023 = vmatmul.mubr.msk.bf16.vlgmr.msra.gmra.mrb[0].mxu1 %vm515_vm1, %v491_v5  ;;  %p1125_p1 = pnand %p1124_p0, %p1387_p3 }
  0x2d   : > { %p1132_p6 = por %p1131_p5, %p1130_p4 }
  0x2e   : > { %p1126_p2 = pneg %p1125_p1 }
  0x2f   : > { %1029 = vmatpush3.bf16.msra.mxu0 %v1122_v7 }
  0x30   : > { %p1133_p7 = pnand %p1132_p6, %p1126_p2 }
  0x32   : > { %1031 = vmatmul.mubr.msk.bf16.vlgmr.msra.gmra.mrb[4].mxu0 %vm515_vm1, %v491_v5 }
  0xfd   : > { %v553_v9 = vpop.f32.mrb[0].mxu0 }
  0xfe   : > { %v554_v11 = vadd.f32 %v975_v8, %v553_v9  ;;  %v1016_v12 = vpop.f32.mrb[1].mxu0 }
  0xff   : > { %v556_v13 = vpop.f32.mrb[2].mxu0  ;;  %v619_v14 = vpop.f32.mrb[0].mxu1 }
 0x100   : > { %v559_v15 = vpack.c.bf16 %v554_v11, %v554_v11  ;;  %v1017_v16 = vpop.f32.mrb[3].mxu0  ;;  %v620_v17 = vadd.f32 %v979_v10, %v619_v14  ;;  %v1024_v18 = vpop.f32.mrb[1].mxu1 }
 0x101   : > { %v622_v19 = vpop.f32.mrb[2].mxu1 }
 0x102   : > { %v625_v20 = vpack.c.bf16 %v620_v17, %v620_v17  ;;  %v1025_v21 = vpop.f32.mrb[3].mxu1  ;;  %561 = vst.msk [vmem:[%s444_s13] sm:$0xf] %vm560_vm2, %v559_v15 }
 0x103   : > { %1136 = shalt.err (!%p1133_p7)
}
 0x104   : > { %s1137_s11 = scalar_lea.hbm %s1464_s28, 64  ;;  %s1141_s20 = scalar_lea.hbm %s1598_s7, 512 }
 0x105   : > { %p1138_p9 = scmp.ne.s32.totalorder %s1464_s28, %s1137_s11  ;;  %p1142_p12 = scmp.lt.u32.totalorder %s1464_s28, %s1598_s7 }
 0x106   : > { %p1143_p13 = scmp.lt.u32.totalorder %s1141_s20, %s1137_s11  ;;  %p1145_p1 = scmp.lt.u32.totalorder %s1137_s11, %s1464_s28 }
 0x107   : > { %p1139_p10 = pnand %p1138_p9, %p1387_p3 }
 0x108   : > { %p1144_p0 = por %p1143_p13, %p1142_p12 }
 0x109   : > { %p1140_p11 = pneg %p1139_p10 }
 0x10a   : > { %p1146_p2 = por %p1145_p1, %p1144_p0 }
 0x10c   : > { %p1147_p4 = pnand %p1146_p2, %p1140_p11 }
 0x10e   : > { %1150 = shalt.err (!%p1147_p4)
}
 0x10f   : > { %1034 = dma.vmem_to_hbm [thread:$0]  (%p1387_p3), %s1466_s21, 64, %s1464_s28, %s693_s24   ;;  %626 = vst.msk [vmem:[%s451_s12] sm:$0xf] %vm560_vm2, %v625_v20  ;;  %v684_v23 = vpop.f32.mrb[4].mxu0 }
 0x110   : > { %s458_s25 = scalar_lea.vmem [#allocation6], %s1439_s18  ;;  %s698_s19 = scalar_lea.sflag [#allocation5], %s1455_s15 }
 0x111   : > { %s1506_s17 = sshll.u32 %s458_s25, 4  ;;  %s1151_s11 = scalar_lea.vmem %s1474_s30, 64  ;;  %s752_s17 = int_to_ptr.vmem [resolvable:$true] %s1506_s17 }
 0x112   : > { %p1152_p5 = scmp.ne.s32.totalorder %s1474_s30, %s1151_s11  ;;  %s1282_s13 = smov [#allocation4]  }
 0x113   : > { %s1155_s26 = sshll.u32 %s1282_s13, 4  ;;  %s1156_s26 = int_to_ptr.vmem [resolvable:$false] %s1155_s26 }
 0x114   : > { %p1153_p6 = pnand %p1152_p5, %p1387_p3  ;;  %s1157_s20 = scalar_lea.vmem %s1156_s26, 128 }
 0x115   : > { %p1158_p9 = scmp.lt.s32.totalorder %s1474_s30, %s1156_s26  ;;  %p1159_p10 = scmp.lt.s32.totalorder %s1157_s20, %s1151_s11 }
 0x116   : > { %p1154_p7 = pneg %p1153_p6 }
 0x117   : > { %p1160_p11 = por %p1159_p10, %p1158_p9 }
 0x119   : > { %p1161_p12 = pnand %p1160_p11, %p1154_p7 }
 0x11b   : > { %1164 = shalt.err (!%p1161_p12)
}
 0x11c   : > { %s1165_s21 = scalar_lea.hbm %s1472_s27, 64  ;;  %s1169_s24 = scalar_lea.hbm %s1599_s8, 512 }
 0x11d   : > { %p1166_p13 = scmp.ne.s32.totalorder %s1472_s27, %s1165_s21  ;;  %p1170_p2 = scmp.lt.u32.totalorder %s1472_s27, %s1599_s8 }
 0x11e   : > { %p1171_p4 = scmp.lt.u32.totalorder %s1169_s24, %s1165_s21  ;;  %p1173_p6 = scmp.lt.u32.totalorder %s1165_s21, %s1472_s27 }
 0x11f   : > { %p1167_p0 = pnand %p1166_p13, %p1387_p3 }
 0x120   : > { %p1172_p5 = por %p1171_p4, %p1170_p2 }
 0x121   : > { %p1168_p1 = pneg %p1167_p0 }
 0x122   : > { %p1174_p7 = por %p1173_p6, %p1172_p5 }
 0x124   : > { %p1175_p9 = pnand %p1174_p7, %p1168_p1 }
 0x126   : > { %1178 = shalt.err (!%p1175_p9)
}
 0x127   : > { %1035 = dma.vmem_to_hbm [thread:$0]  (%p1387_p3), %s1474_s30, 64, %s1472_s27, %s698_s19   ;;  %v685_v24 = vadd.f32 %v983_v22, %v684_v23  ;;  %v1032_v25 = vpop.f32.mrb[5].mxu0 }
 0x128   : > { %v687_v26 = vpop.f32.mrb[6].mxu0  ;;  %s1536_s26 = scalar_lea.hbm %s1600_s9, %s1446_s29  ;;  %s1179_s20 = scalar_lea.vmem %s752_s17, 64 }
 0x129   : > { %v690_v27 = vpack.c.bf16 %v685_v24, %v685_v24  ;;  %v1033_v28 = vpop.f32.mrb[7].mxu0  ;;  %p1180_p10 = scmp.ne.s32.totalorder %s752_s17, %s1179_s20  ;;  %s1283_s30 = smov [#allocation6]  }
 0x12a   : > { %s1183_s27 = sshll.u32 %s1283_s30, 4  ;;  %s1184_s27 = int_to_ptr.vmem [resolvable:$false] %s1183_s27 }
 0x12b   : > { %691 = vst.msk [vmem:[%s458_s25] sm:$0xf] %vm560_vm2, %v690_v27  ;;  %p1181_p11 = pnand %p1180_p10, %p1387_p3  ;;  %s1185_s21 = scalar_lea.vmem %s1184_s27, 128 }
 0x12c   : > { %p1186_p13 = scmp.lt.s32.totalorder %s752_s17, %s1184_s27  ;;  %p1187_p0 = scmp.lt.s32.totalorder %s1185_s21, %s1179_s20 }
 0x12d   : > { %p1182_p12 = pneg %p1181_p11 }
 0x12e   : > { %p1188_p1 = por %p1187_p0, %p1186_p13 }
 0x130   : > { %p1189_p2 = pnand %p1188_p1, %p1182_p12 }
 0x132   : > { %1192 = shalt.err (!%p1189_p2)
}
 0x133   : > { %s1193_s18 = scalar_lea.hbm %s1536_s26, 64  ;;  %s1197_s12 = scalar_lea.hbm %s1600_s9, 512 }
 0x134   : > { %p1194_p4 = scmp.ne.s32.totalorder %s1536_s26, %s1193_s18  ;;  %p1198_p7 = scmp.lt.u32.totalorder %s1536_s26, %s1600_s9 }
 0x135   : > { %p1199_p9 = scmp.lt.u32.totalorder %s1197_s12, %s1193_s18  ;;  %p1201_p11 = scmp.lt.u32.totalorder %s1193_s18, %s1536_s26 }
 0x136   : > { %p1195_p5 = pnand %p1194_p4, %p1387_p3 }
 0x137   : > { %p1200_p10 = por %p1199_p9, %p1198_p7 }
 0x138   : > { %p1196_p6 = pneg %p1195_p5 }
 0x139   : > { %p1202_p12 = por %p1201_p11, %p1200_p10 }
 0x13b   : > { %p1203_p13 = pnand %p1202_p12, %p1196_p6 }
 0x13d   : > { %1206 = shalt.err (!%p1203_p13)
}
 0x13e   : > { %1036 = dma.vmem_to_hbm [thread:$0]  (%p1387_p3), %s752_s17, 64, %s1536_s26, %s698_s19  }
 0x13f PF: > { %s1621_s23 = sld [smem:[#allocation9_spill]]  ;;  %p1050_p0 = scmp.ge.s32.totalorder %s1277_s16, 2 }
 0x141   : > { %p1041_p1 = pnand %p1050_p0, %p1398_p8 }
 0x145   : > { %s763_s11 = sand.u32 1, %s1621_s23  }
 0x146   : > { %s764_s13 = scalar_lea.sflag [#allocation3], %s763_s11 }
 0x147   : > { %1240 = dma.done.wait (!%p1041_p1), %s764_s13, 64  }
 0x148   : > { %1242 = vsyncadd (!%p1041_p1), %s764_s13, 4294967232  ;;  %s1623_s20 = sadd.s32 4294967294, %s1277_s16  }
 0x149   : > { %s772_s30 = sand.u32 1, %s1623_s20  }
 0x14a   : > { %s773_s27 = scalar_lea.sflag [#allocation5], %s772_s30 }
 0x14b   : > { %1244 = dma.done.wait (!%p1041_p1), %s773_s27, 128  }
 0x14c   : > { %1246 = vsyncadd (!%p1041_p1), %s773_s27, 4294967168  ;;  %s26_s16 = sadd.s32 1, %s1277_s16   ;;  %s1624_s22 = sld [smem:[#allocation10_spill]] }
 0x14d   : > { %p23_p3 = scmp.ge.s32.totalorder %s26_s16, 10   ;;  %s1625_s11 = sld [smem:[#allocation16_spill]] }
 0x14e   : > { %s1626_s12 = sld [smem:[#allocation11_spill]]  ;;  %s1627_s13 = sld [smem:[#allocation12_spill]] }
 0x14f   : > { %s1628_s14 = sld [smem:[#allocation13_spill]]  ;;  %s1629_s15 = sld [smem:[#allocation14_spill]] }
 0x150   : > { %s1630_s30 = smov %s1253_s10  ;;  %25 = sbr.rel (!%p23_p3) target bundleno = 7 (0x7), region = 133 }
 0x152   : > { %s1631_s10 = smov %s1624_s22 }
 0x157   :  { %787 = vsyncpa [#allocation3], 1 }
 0x158   :  { %789 = vsyncpa [#allocation3 + $0x1], 1 }
 0x159   :  { %790 = vsyncpa [#allocation5], 1 }
 0x15a   :  { %792 = vsyncpa [#allocation5 + $0x1], 1 }

</bundles_post_ra>
